<compile_context>
chip_gen: v6e
topology: v6e:2x2x1
jax: 0.10.0
libtpu: 0.0.40
codegen_flags: <defaults>
</compile_context>

<pallas_src>
import jax
import jax.numpy as jnp
from jax.experimental import pallas as pl
from jax.experimental.pallas import tpu as pltpu

_LANE = 128     # vreg lane width: keep the hidden axis lane-dense
_SUBLANE = 8    # vreg sublane width: row-tile granularity


def _round_up(v: int, m: int) -> int:
    return (v + m - 1) // m * m


def _vmem_capacity_bytes(default: int = 64 * 1024 * 1024) -> int:
    """Trace-time VMEM capacity query; conservative 64 MiB (v7x) fallback."""
    try:
        return int(pltpu.get_tpu_info().vmem_capacity_bytes)
    except Exception:
        return default


def _spec(shape, index_map, pipeline_mode=None):
    if pipeline_mode is None:
        return pl.BlockSpec(shape, index_map)
    return pl.BlockSpec(shape, index_map, pipeline_mode=pipeline_mode)


def _layernorm_residual(s, resid_f32, bias, a2, b2, *, hidden, pad_cols, eps,
                        approx_recip):
    """Harvard LayerNorm (unbiased std, (std+eps) denom) + residual; all f32."""
    inv_h = 1.0 / hidden
    inv_hm1 = 1.0 / max(hidden - 1, 1)          # guard hidden == 1
    s = s + bias
    mean = jnp.sum(s, axis=-1, keepdims=True) * inv_h            # (TM, 1)
    centered = s - mean
    sum_sq = jnp.sum(centered * centered, axis=-1, keepdims=True)
    if pad_cols:
        # Padded hidden columns of s are exactly 0 by construction, so each
        # contributes (-mean)^2 to the raw sum of squares: subtract with one
        # (TM,1) FMA instead of an iota/compare/select mask over the full tile.
        sum_sq = sum_sq - float(pad_cols) * (mean * mean)
    std = jnp.sqrt(sum_sq * inv_hm1)                              # unbiased (N-1)
    inv = pl.reciprocal(std + eps, approx=approx_recip)           # EUP slot
    return resid_f32 + centered * (a2 * inv) + b2


def _make_resident_kernel(hidden: int, hidden_padded: int, eps: float,
                          approx_recip: bool):
    """Resident-W path: one row-tile grid axis, W stays in VMEM across the grid."""
    pad_cols = hidden_padded - hidden

    def kernel(x_ref, w_ref, p_ref, o_ref):
        x = x_ref[...]                                            # (TM, Hp)
        # MXU matmul: operands in matmul dtype (bf16 by default), f32 accumulate.
        s = jnp.dot(x.astype(w_ref.dtype), w_ref[...],
                    preferred_element_type=jnp.float32)
        out = _layernorm_residual(
            s, x.astype(jnp.float32),
            p_ref[0:1, :], p_ref[1:2, :], p_ref[2:3, :],
            hidden=hidden, pad_cols=pad_cols, eps=eps, approx_recip=approx_recip)
        o_ref[...] = out.astype(o_ref.dtype)

    return kernel


def _make_k_tiled_kernel(hidden: int, hidden_padded: int, eps: float,
                         approx_recip: bool, tk: int):
    """Streamed-W path for large H: grid=(rows, K), f32 accumulator scratch."""
    pad_cols = hidden_padded - hidden

    def kernel(x_ref, w_ref, p_ref, o_ref, acc_ref):
        k = pl.program_id(1)
        nk = pl.num_programs(1)

        @pl.when(k == 0)
        def _():
            acc_ref[...] = jnp.zeros_like(acc_ref)

        x = x_ref[...]                                            # (TM, TK)
        acc_ref[...] += jnp.dot(x.astype(w_ref.dtype), w_ref[...],
                                preferred_element_type=jnp.float32)

        # Stash the residual x chunk in the (VMEM-resident) output block so x is
        # read from HBM exactly once; the output block index is constant in k.
        col0 = pl.multiple_of(k * tk, _LANE)
        o_ref[:, pl.ds(col0, tk)] = x.astype(o_ref.dtype)

        @pl.when(k == nk - 1)
        def _():
            out = _layernorm_residual(
                acc_ref[...], o_ref[...].astype(jnp.float32),
                p_ref[0:1, :], p_ref[1:2, :], p_ref[2:3, :],
                hidden=hidden, pad_cols=pad_cols, eps=eps,
                approx_recip=approx_recip)
            o_ref[...] = out.astype(o_ref.dtype)

    return kernel


def sublayer_connection(x, w, b, a_2, b_2, eps=1e-6, *,
                        matmul_dtype=jnp.bfloat16,
                        block_rows=None,
                        k_block=None,
                        force_k_tiling=None,
                        approx_recip=True,
                        vmem_limit_bytes=None):
    """x: (B, S, H); w: (H, H); b, a_2, b_2: (H,). Returns (B, S, H).

    Computes  x + LayerNorm(dropout_eval(x @ w + b)).

    Defaults are generation-aware: on 128 MiB-VMEM parts (v5e/v6e) row tiles of
    512 and a ~100 MiB scoped-VMEM budget; on 64 MiB parts (v7x) row tiles of
    256 and ~51 MiB.  When the (bf16) resident W plus double-buffered tiles do
    not fit the budget, the kernel switches to a K-tiled streamed-W path.
    """
    B, S, H = x.shape
    M = B * S

    vmem_cap = _vmem_capacity_bytes()
    if vmem_limit_bytes is None:
        vmem_limit_bytes = min(int(vmem_cap * 0.8), 100 * 1024 * 1024)
    if block_rows is None:
        block_rows = 512 if vmem_cap >= 96 * 1024 * 1024 else 256

    # Lane-dense hidden (multiple of 128) and sublane-aligned row tiling.
    Hp = _round_up(max(H, _LANE), _LANE)
    TM = min(block_rows, _round_up(M, _SUBLANE))
    # Keep >= 2 row tiles so the "parallel" axis can be split across TensorCores.
    if _round_up(M, TM) // TM < 2 and TM > _SUBLANE:
        TM = max(_SUBLANE, _round_up((M + 1) // 2, _SUBLANE))
    Mp = _round_up(M, TM)

    # VMEM budget check for the resident-W path (count W x2 conservatively in
    # case the single-buffer request falls back to default double-buffering).
    x_bytes = jnp.dtype(x.dtype).itemsize
    w_bytes = Hp * Hp * jnp.dtype(matmul_dtype).itemsize
    tile_bytes = 4 * TM * Hp * x_bytes          # double-buffered x + out tiles
    resident_fits = (2 * w_bytes + tile_bytes) <= int(vmem_limit_bytes * 0.85)
    use_k_tiling = (not resident_fits) if force_k_tiling is None else force_k_tiling

    # --- operand prep (skip the pad/slice HBM passes when already aligned) ---
    x2d = x.reshape(M, H)
    if Mp != M or Hp != H:
        x2d = jnp.pad(x2d, ((0, Mp - M), (0, Hp - H)))
    w_p = w if Hp == H else jnp.pad(w, ((0, Hp - H), (0, Hp - H)))
    w_p = w_p.astype(matmul_dtype)

    def _pad_vec(v):
        return v if Hp == H else jnp.pad(v, (0, Hp - H))

    # Fuse bias / a_2 / b_2 into one (3, Hp) constant-index operand (1 DMA stream).
    params = jnp.stack([_pad_vec(b), _pad_vec(a_2), _pad_vec(b_2)]).astype(jnp.float32)

    out_shape = jax.ShapeDtypeStruct((Mp, Hp), x.dtype)

    def call(single_buffer_resident):
        resident_mode = pl.Buffered(1) if single_buffer_resident else None

        if use_k_tiling:
            TK = k_block if k_block is not None else (
                512 if Hp % 512 == 0 else (256 if Hp % 256 == 0 else 128))
            assert Hp % TK == 0, "k_block must divide the padded hidden size"
            return pl.pallas_call(
                _make_k_tiled_kernel(H, Hp, eps, approx_recip, TK),
                out_shape=out_shape,
                grid=(Mp // TM, Hp // TK),
                in_specs=[
                    pl.BlockSpec((TM, TK), lambda i, k: (i, k)),   # x chunks
                    pl.BlockSpec((TK, Hp), lambda i, k: (k, 0)),   # W streamed over K
                    _spec((3, Hp), lambda i, k: (0, 0), resident_mode),
                ],
                out_specs=pl.BlockSpec((TM, Hp), lambda i, k: (i, 0)),
                scratch_shapes=[pltpu.VMEM((TM, Hp), jnp.float32)],
                compiler_params=pltpu.CompilerParams(
                    dimension_semantics=("parallel", "arbitrary"),
                    vmem_limit_bytes=vmem_limit_bytes,
                ),
            )(x2d, w_p, params)

        return pl.pallas_call(
            _make_resident_kernel(H, Hp, eps, approx_recip),
            out_shape=out_shape,
            grid=(Mp // TM,),
            in_specs=[
                pl.BlockSpec((TM, Hp), lambda i: (i, 0)),          # x row tile
                _spec((Hp, Hp), lambda i: (0, 0), resident_mode),  # W resident
                _spec((3, Hp), lambda i: (0, 0), resident_mode),   # bias/a_2/b_2
            ],
            out_specs=pl.BlockSpec((TM, Hp), lambda i: (i, 0)),
            compiler_params=pltpu.CompilerParams(
                dimension_semantics=("parallel",),
                vmem_limit_bytes=vmem_limit_bytes,
            ),
        )(x2d, w_p, params)

    try:
        out = call(True)
    except Exception:
        # Fallback if pl.Buffered(1) single-buffering of the constant-index
        # operands is rejected by this JAX build; costs 2x VMEM for W only.
        out = call(False)

    if Mp != M or Hp != H:
        out = out[:M, :H]
    return out.reshape(B, S, H)


def reference(x, w, b, a_2, b_2, eps=1e-6):
    s = jnp.einsum("bsh,hk->bsk", x.astype(jnp.float32), w.astype(jnp.float32)) + b
    mean = jnp.mean(s, axis=-1, keepdims=True)
    var = jnp.sum((s - mean) ** 2, axis=-1, keepdims=True) / (s.shape[-1] - 1)
    std = jnp.sqrt(var)
    normed = a_2 * (s - mean) / (std + eps) + b_2
    return (x + normed).astype(x.dtype)


if __name__ == "__main__":
    key = jax.random.PRNGKey(0)
    kx, kw, kb, kx2, kw2, kb2 = jax.random.split(key, 6)

    # --- case 1: small H (padded to 128 lanes), ragged rows, exact-math path ---
    B, S, H = 2, 5, 32
    x = jax.random.normal(kx, (B, S, H), dtype=jnp.float32)
    w = jax.random.normal(kw, (H, H), dtype=jnp.float32) * (1.0 / jnp.sqrt(H))
    b = jax.random.normal(kb, (H,), dtype=jnp.float32) * 0.01
    a_2 = jnp.ones((H,), dtype=jnp.float32)   # LayerNorm params per __init__
    b_2 = jnp.zeros((H,), dtype=jnp.float32)
    ref = reference(x, w, b, a_2, b_2)

    out_exact = jax.block_until_ready(
        sublayer_connection(x, w, b, a_2, b_2,
                            matmul_dtype=jnp.float32, approx_recip=False))
    assert out_exact.shape == (B, S, H)
    assert jnp.allclose(out_exact, ref, atol=1e-4, rtol=1e-4), "mismatch (exact f32)"

    # --- case 2: default fast path (bf16 MXU operands + EUP reciprocal) ---
    out_fast = jax.block_until_ready(sublayer_connection(x, w, b, a_2, b_2))
    assert out_fast.shape == (B, S, H)
    assert jnp.allclose(out_fast, ref, atol=6e-2, rtol=6e-2), "mismatch (bf16 fast)"

    # --- case 3: K-tiled streamed-W path (forced), multi-step contraction ---
    B2, S2, H2 = 2, 8, 256
    x2 = jax.random.normal(kx2, (B2, S2, H2), dtype=jnp.float32)
    w2 = jax.random.normal(kw2, (H2, H2), dtype=jnp.float32) * (1.0 / jnp.sqrt(H2))
    bias2 = jax.random.normal(kb2, (H2,), dtype=jnp.float32) * 0.01
    a2_2 = jnp.ones((H2,), dtype=jnp.float32)
    b2_2 = jnp.zeros((H2,), dtype=jnp.float32)
    ref2 = reference(x2, w2, bias2, a2_2, b2_2)

    out_k = jax.block_until_ready(
        sublayer_connection(x2, w2, bias2, a2_2, b2_2,
                            matmul_dtype=jnp.float32, approx_recip=False,
                            force_k_tiling=True, k_block=128))
    assert out_k.shape == (B2, S2, H2)
    assert jnp.allclose(out_k, ref2, atol=5e-4, rtol=5e-4), "mismatch (K-tiled)"

    print("KERNEL_OK")
</pallas_src>

<mosaic_0001>
module attributes {stable_mosaic.version = 11 : i64} {
  func.func @kernel(%arg0: i32, %arg1: memref<8x128xf32, #tpu.memory_space<vmem>>, %arg2: memref<128x128xf32, #tpu.memory_space<vmem>>, %arg3: memref<3x128xf32, #tpu.memory_space<vmem>>, %arg4: memref<8x128xf32, #tpu.memory_space<vmem>>) attributes {dimension_semantics = [#tpu.dimension_semantics<parallel>], iteration_bounds = array<i64: 2>, scalar_prefetch = 0 : i64, scratch_operands = 0 : i64, tpu.core_type = #tpu.core_type<tc>, window_params = [{transform_indices = @transform_0, window_bounds = array<i64: 8, 128>}, {pipeline_mode = #tpu.pipeline_mode<synchronous>, transform_indices = @transform_1, window_bounds = array<i64: 128, 128>}, {pipeline_mode = #tpu.pipeline_mode<synchronous>, transform_indices = @transform_2, window_bounds = array<i64: 3, 128>}, {transform_indices = @transform_3, window_bounds = array<i64: 8, 128>}]} {
    %c0 = arith.constant 0 : index
    %c0_0 = arith.constant 0 : index
    %0 = vector.load %arg1[%c0, %c0_0] : memref<8x128xf32, #tpu.memory_space<vmem>>, vector<8x128xf32>
    %c0_1 = arith.constant 0 : index
    %c0_2 = arith.constant 0 : index
    %1 = vector.load %arg2[%c0_1, %c0_2] : memref<128x128xf32, #tpu.memory_space<vmem>>, vector<128x128xf32>
    %cst = arith.constant dense<0.000000e+00> : vector<8x128xf32>
    %2 = tpu.matmul %0, %1, %cst {dimension_numbers = #tpu.dot_dimension_numbers<[1], [0], [0], [1], [0, 0, 1, 1], [], []>} : vector<8x128xf32>, vector<128x128xf32>, vector<8x128xf32> -> vector<8x128xf32>
    %c0_3 = arith.constant 0 : index
    %c0_4 = arith.constant 0 : index
    %3 = vector.load %arg3[%c0_3, %c0_4] : memref<3x128xf32, #tpu.memory_space<vmem>>, vector<1x128xf32>
    %c1 = arith.constant 1 : index
    %c0_5 = arith.constant 0 : index
    %4 = vector.load %arg3[%c1, %c0_5] : memref<3x128xf32, #tpu.memory_space<vmem>>, vector<1x128xf32>
    %c2 = arith.constant 2 : index
    %c0_6 = arith.constant 0 : index
    %5 = vector.load %arg3[%c2, %c0_6] : memref<3x128xf32, #tpu.memory_space<vmem>>, vector<1x128xf32>
    %6 = vector.broadcast %3 : vector<1x128xf32> to vector<8x128xf32>
    %7 = arith.addf %2, %6 : vector<8x128xf32>
    %cst_7 = arith.constant dense<0.000000e+00> : vector<8xf32>
    %8 = vector.multi_reduction <add>, %7, %cst_7 [1] : vector<8x128xf32> to vector<8xf32>
    %9 = vector.shape_cast %8 : vector<8xf32> to vector<8x1xf32>
    %cst_8 = arith.constant 3.125000e-02 : f32
    %10 = vector.broadcast %cst_8 : f32 to vector<8x1xf32>
    %11 = arith.mulf %9, %10 : vector<8x1xf32>
    %12 = vector.broadcast %11 : vector<8x1xf32> to vector<8x128xf32>
    %13 = arith.subf %7, %12 : vector<8x128xf32>
    %14 = arith.mulf %13, %13 : vector<8x128xf32>
    %cst_9 = arith.constant dense<0.000000e+00> : vector<8xf32>
    %15 = vector.multi_reduction <add>, %14, %cst_9 [1] : vector<8x128xf32> to vector<8xf32>
    %16 = vector.shape_cast %15 : vector<8xf32> to vector<8x1xf32>
    %17 = arith.mulf %11, %11 : vector<8x1xf32>
    %cst_10 = arith.constant 9.600000e+01 : f32
    %18 = vector.broadcast %cst_10 : f32 to vector<8x1xf32>
    %19 = arith.mulf %18, %17 : vector<8x1xf32>
    %20 = arith.subf %16, %19 : vector<8x1xf32>
    %cst_11 = arith.constant 0.0322580636 : f32
    %21 = vector.broadcast %cst_11 : f32 to vector<8x1xf32>
    %22 = arith.mulf %20, %21 : vector<8x1xf32>
    %23 = math.sqrt %22 : vector<8x1xf32>
    %cst_12 = arith.constant 9.99999997E-7 : f32
    %24 = vector.broadcast %cst_12 : f32 to vector<8x1xf32>
    %25 = arith.addf %23, %24 : vector<8x1xf32>
    %26 = tpu.reciprocal %25 : vector<8x1xf32> -> vector<8x1xf32>
    %27 = vector.broadcast %4 : vector<1x128xf32> to vector<8x128xf32>
    %28 = vector.broadcast %26 : vector<8x1xf32> to vector<8x128xf32>
    %29 = arith.mulf %27, %28 : vector<8x128xf32>
    %30 = arith.mulf %13, %29 : vector<8x128xf32>
    %31 = arith.addf %0, %30 : vector<8x128xf32>
    %32 = vector.broadcast %5 : vector<1x128xf32> to vector<8x128xf32>
    %33 = arith.addf %31, %32 : vector<8x128xf32>
    %c0_13 = arith.constant 0 : index
    %c0_14 = arith.constant 0 : index
    %34 = vector.load %arg4[%c0_13, %c0_14] : memref<8x128xf32, #tpu.memory_space<vmem>>, vector<8x128xf32>
    tpu.vector_store %arg4[%c0_13, %c0_14], %33 {strides = array<i32>} : memref<8x128xf32, #tpu.memory_space<vmem>>, vector<8x128xf32>,
    return
  }
  func.func @transform_0(%arg0: i32) -> (i32, i32) {
    %c0_i32 = arith.constant 0 : i32
    %c0_i32_0 = arith.constant 0 : i32
    return %arg0, %c0_i32 : i32, i32
  }
  func.func @transform_1(%arg0: i32) -> (i32, i32) {
    %c0_i32 = arith.constant 0 : i32
    %c0_i32_0 = arith.constant 0 : i32
    %c0_i32_1 = arith.constant 0 : i32
    return %c0_i32, %c0_i32_0 : i32, i32
  }
  func.func @transform_2(%arg0: i32) -> (i32, i32) {
    %c0_i32 = arith.constant 0 : i32
    %c0_i32_0 = arith.constant 0 : i32
    %c0_i32_1 = arith.constant 0 : i32
    return %c0_i32, %c0_i32_0 : i32, i32
  }
  func.func @transform_3(%arg0: i32) -> (i32, i32) {
    %c0_i32 = arith.constant 0 : i32
    %c0_i32_0 = arith.constant 0 : i32
    return %arg0, %c0_i32 : i32, i32
  }
}

module attributes {stable_mosaic.version = 11 : i64} {
  func.func @kernel(%arg0: i32, %arg1: memref<8x128xf32, #tpu.memory_space<vmem>>, %arg2: memref<128x128xf32, #tpu.memory_space<vmem>>, %arg3: memref<3x128xf32, #tpu.memory_space<vmem>>, %arg4: memref<8x128xf32, #tpu.memory_space<vmem>>) attributes {dimension_semantics = [#tpu.dimension_semantics<parallel>], iteration_bounds = array<i64: 2>, scalar_prefetch = 0 : i64, scratch_operands = 0 : i64, tpu.core_type = #tpu.core_type<tc>, window_params = [{transform_indices = @transform_0, window_bounds = array<i64: 8, 128>}, {pipeline_mode = #tpu.pipeline_mode<synchronous>, transform_indices = @transform_1, window_bounds = array<i64: 128, 128>}, {pipeline_mode = #tpu.pipeline_mode<synchronous>, transform_indices = @transform_2, window_bounds = array<i64: 3, 128>}, {transform_indices = @transform_3, window_bounds = array<i64: 8, 128>}]} {
    %c0 = arith.constant 0 : index
    %c0_0 = arith.constant 0 : index
    %0 = vector.load %arg1[%c0, %c0_0] : memref<8x128xf32, #tpu.memory_space<vmem>>, vector<8x128xf32>
    %c0_1 = arith.constant 0 : index
    %c0_2 = arith.constant 0 : index
    %1 = vector.load %arg2[%c0_1, %c0_2] : memref<128x128xf32, #tpu.memory_space<vmem>>, vector<128x128xf32>
    %cst = arith.constant dense<0.000000e+00> : vector<8x128xf32>
    %2 = tpu.matmul %0, %1, %cst {dimension_numbers = #tpu.dot_dimension_numbers<[1], [0], [0], [1], [0, 0, 1, 1], [], []>} : vector<8x128xf32>, vector<128x128xf32>, vector<8x128xf32> -> vector<8x128xf32>
    %c0_3 = arith.constant 0 : index
    %c0_4 = arith.constant 0 : index
    %3 = vector.load %arg3[%c0_3, %c0_4] : memref<3x128xf32, #tpu.memory_space<vmem>>, vector<1x128xf32>
    %c1 = arith.constant 1 : index
    %c0_5 = arith.constant 0 : index
    %4 = vector.load %arg3[%c1, %c0_5] : memref<3x128xf32, #tpu.memory_space<vmem>>, vector<1x128xf32>
    %c2 = arith.constant 2 : index
    %c0_6 = arith.constant 0 : index
    %5 = vector.load %arg3[%c2, %c0_6] : memref<3x128xf32, #tpu.memory_space<vmem>>, vector<1x128xf32>
    %6 = vector.broadcast %3 : vector<1x128xf32> to vector<8x128xf32>
    %7 = arith.addf %2, %6 : vector<8x128xf32>
    %cst_7 = arith.constant dense<0.000000e+00> : vector<8xf32>
    %8 = vector.multi_reduction <add>, %7, %cst_7 [1] : vector<8x128xf32> to vector<8xf32>
    %9 = vector.shape_cast %8 : vector<8xf32> to vector<8x1xf32>
    %cst_8 = arith.constant 3.125000e-02 : f32
    %10 = vector.broadcast %cst_8 : f32 to vector<8x1xf32>
    %11 = arith.mulf %9, %10 : vector<8x1xf32>
    %12 = vector.broadcast %11 : vector<8x1xf32> to vector<8x128xf32>
    %13 = arith.subf %7, %12 : vector<8x128xf32>
    %14 = arith.mulf %13, %13 : vector<8x128xf32>
    %cst_9 = arith.constant dense<0.000000e+00> : vector<8xf32>
    %15 = vector.multi_reduction <add>, %14, %cst_9 [1] : vector<8x128xf32> to vector<8xf32>
    %16 = vector.shape_cast %15 : vector<8xf32> to vector<8x1xf32>
    %17 = arith.mulf %11, %11 : vector<8x1xf32>
    %cst_10 = arith.constant 9.600000e+01 : f32
    %18 = vector.broadcast %cst_10 : f32 to vector<8x1xf32>
    %19 = arith.mulf %18, %17 : vector<8x1xf32>
    %20 = arith.subf %16, %19 : vector<8x1xf32>
    %cst_11 = arith.constant 0.0322580636 : f32
    %21 = vector.broadcast %cst_11 : f32 to vector<8x1xf32>
    %22 = arith.mulf %20, %21 : vector<8x1xf32>
    %23 = math.sqrt %22 : vector<8x1xf32>
    %cst_12 = arith.constant 9.99999997E-7 : f32
    %24 = vector.broadcast %cst_12 : f32 to vector<8x1xf32>
    %25 = arith.addf %23, %24 : vector<8x1xf32>
    %26 = tpu.reciprocal %25 : vector<8x1xf32> -> vector<8x1xf32>
    %27 = vector.broadcast %4 : vector<1x128xf32> to vector<8x128xf32>
    %28 = vector.broadcast %26 : vector<8x1xf32> to vector<8x128xf32>
    %29 = arith.mulf %27, %28 : vector<8x128xf32>
    %30 = arith.mulf %13, %29 : vector<8x128xf32>
    %31 = arith.addf %0, %30 : vector<8x128xf32>
    %32 = vector.broadcast %5 : vector<1x128xf32> to vector<8x128xf32>
    %33 = arith.addf %31, %32 : vector<8x128xf32>
    %c0_13 = arith.constant 0 : index
    %c0_14 = arith.constant 0 : index
    %34 = vector.load %arg4[%c0_13, %c0_14] : memref<8x128xf32, #tpu.memory_space<vmem>>, vector<8x128xf32>
    tpu.vector_store %arg4[%c0_13, %c0_14], %33 {strides = array<i32>} : memref<8x128xf32, #tpu.memory_space<vmem>>, vector<8x128xf32>,
    return
  }
  func.func @transform_0(%arg0: i32) -> (i32, i32) {
    %c0_i32 = arith.constant 0 : i32
    %c0_i32_0 = arith.constant 0 : i32
    return %arg0, %c0_i32 : i32, i32
  }
  func.func @transform_1(%arg0: i32) -> (i32, i32) {
    %c0_i32 = arith.constant 0 : i32
    %c0_i32_0 = arith.constant 0 : i32
    %c0_i32_1 = arith.constant 0 : i32
    return %c0_i32, %c0_i32_0 : i32, i32
  }
  func.func @transform_2(%arg0: i32) -> (i32, i32) {
    %c0_i32 = arith.constant 0 : i32
    %c0_i32_0 = arith.constant 0 : i32
    %c0_i32_1 = arith.constant 0 : i32
    return %c0_i32, %c0_i32_0 : i32, i32
  }
  func.func @transform_3(%arg0: i32) -> (i32, i32) {
    %c0_i32 = arith.constant 0 : i32
    %c0_i32_0 = arith.constant 0 : i32
    return %arg0, %c0_i32 : i32, i32
  }
}

</mosaic_0001>

<bundles_post_ra>
// kernel: tpu_custom_call.1
= control target key start
LH: loop header
LB: loop body
LE: loop exit
PB: predicated region body
PF: predicated region fallthrough
CT: control target
= control target key end

     0   :  { %8 = vsyncpa [#allocation3], 0  ;;  %s939_s0 = inlined_call_operand.hbm [shape: f32[16,128], index: 0, kind: input, shape index: {}]   ;;  %s940_s1 = inlined_call_operand.hbm [shape: f32[128,128], index: 1, kind: input, shape index: {}]   ;;  %s941_s2 = inlined_call_operand.hbm [shape: f32[3,128], index: 2, kind: input, shape index: {}]   ;;  %s942_s3 = inlined_call_operand.hbm [shape: f32[16,128], index: 3, kind: output, shape index: {}]  }
   0x1   :  { %10 = vsyncpa [#allocation3 + $0x1], 0 }
   0x2   :  { %11 = vsyncpa [#allocation6], 0 }
   0x3   :  { %12 = vsyncpa [#allocation4], 0 }
   0x4   :  { %14 = vsyncpa [#allocation4 + $0x1], 0  ;;  %s767_s12 = smov 0   ;;  %s769_s13 = smov 0  }
   0x5   :  { %s771_s14 = smov 0   ;;  %s773_s15 = smov 0  }
   0x6 LB: > { %s788_s16 = sadd.s32 4294967295, %s737_s15   ;;  %s443_s17 = sadd.s32 4294967294, %s737_s15   ;;  %s737_s15 = sphi %s773_s15, %s964_s15   ;;  %s733_s14 = sphi %s771_s14, %s963_s14   ;;  %s729_s13 = sphi %s769_s13, %s962_s13   ;;  %s725_s12 = sphi %s767_s12, %s961_s12  }
   0x7   : > { %p40_p0 = scmp.ne.s32.totalorder %s729_s13, %s725_s12  ;;  %p943_p1 = scmp.eq.s32.totalorder %s788_s16, 0 }
   0x8   : > { %p112_p3 = scmp.eq.s32.totalorder %s443_s17, 1  ;;  %p444_p5 = scmp.ge.s32.totalorder %s737_s15, 1 }
   0x9   : > { %p797_p4 = por %p943_p1, %p40_p0  ;;  %p119_p7 = scmp.lt.s32.totalorder %s737_s15, 3 }
   0xa   : > { %p802_p6 = por %p112_p3, %p40_p0  ;;  %s739_s21 = smov [#allocation5]  }
   0xb   : > { %s947_s18 = scalar_select %p797_p4, 1, 0 }
   0xc   : > { %s948_s19 = scalar_select %p802_p6, 1, 0 }
   0xd   : > { %p807_p8 = pnand %p444_p5, %p119_p7  ;;  %s131_s22 = sshll.u32 %s739_s21, 4  ;;  %s132_s22 = int_to_ptr.vmem [resolvable:$true] %s131_s22 }
   0xe   : > { %s740_s24 = smov [#allocation7]   ;;  %s600_s26 = scalar_lea.vmem %s132_s22, 2048 }
   0xf   : > { %s949_s20 = scalar_select %p807_p8, 1, 0 }
  0x10   : > { %p526_p9 = pneg %p807_p8  ;;  %s145_s25 = sshll.u32 %s740_s24, 4  ;;  %s146_s25 = int_to_ptr.vmem [resolvable:$true] %s145_s25 }
  0x11   : > { %p601_p13 = scmp.ne.s32.totalorder %s132_s22, %s600_s26  ;;  %p608_p5 = scmp.lt.s32.totalorder %s132_s22, %s132_s22 }
  0x12   : > { %p816_p11 = pnand %p526_p9, %p943_p1  ;;  %p609_p7 = scmp.lt.s32.totalorder %s600_s26, %s600_s26 }
  0x14   : > { %p591_p12 = pneg %p816_p11  ;;  %p610_p10 = por %p609_p7, %p608_p5 }
  0x16   : > { %p603_p0 = pnand %p601_p13, %p591_p12 }
  0x18   : > { %p604_p3 = pneg %p603_p0 }
  0x1a   : > { %p611_p9 = pnand %p610_p10, %p604_p3 }
  0x1c   : > { %614 = shalt.err (!%p611_p9)
}
  0x1d   : > { %s741_s27 = smov 128   ;;  %s742_s28 = smov 8  }
  0x1e   : > { %529 = dma.hbm_to_vmem [thread:$0]  (!%p816_p11), %s940_s1, 2048, %s132_s22, [#allocation6], %s741_s27, %s741_s27, %s742_s28  }
  0x1f   : > { %s626_s4 = scalar_lea.vmem %s146_s25, 64  ;;  %p634_p2 = scmp.lt.s32.totalorder %s146_s25, %s146_s25 }
  0x20   : > { %p627_p1 = scmp.ne.s32.totalorder %s146_s25, %s626_s4  ;;  %p635_p6 = scmp.lt.s32.totalorder %s626_s4, %s626_s4 }
  0x22   : > { %p629_p13 = pnand %p627_p1, %p591_p12  ;;  %p636_p5 = por %p635_p6, %p634_p2 }
  0x24   : > { %p630_p0 = pneg %p629_p13 }
  0x26   : > { %p637_p10 = pnand %p636_p5, %p630_p0 }
  0x28   : > { %640 = shalt.err (!%p637_p10)
}
  0x29   : > { %532 = dma.hbm_to_vmem [thread:$0]  (!%p816_p11), %s941_s2, 64, %s146_s25, [#allocation6]  }
  0x2a   : > { %s839_s7 = sadd.s32 1, %s737_s15   ;;  %s27_s8 = sadd.s32 1, %s733_s14 }
  0x2b   : > { %s24_s9 = ssub.s32 %s737_s15, %s839_s7  ;;  %p34_p1 = scmp.ne.s32.totalorder %s733_s14, %s729_s13 }
  0x2c   : > { %p25_p2 = scmp.eq.s32.totalorder %s24_s9, 0  ;;  %p35_p6 = scmp.eq.s32.totalorder %s737_s15, 0 }
  0x2d   : > { %p951_p12 = scmp.eq.s32.totalorder %s788_s16, 1  ;;  %p543_p7 = scmp.lt.s32.totalorder %s737_s15, 2 }
  0x2e   : > { %s855_s11 = scalar_select %p25_p2, %s733_s14, %s27_s8  }
  0x2f   : > { %p849_p3 = por %p951_p12, %p34_p1  ;;  %p36_p9 = por %p35_p6, %p34_p1 }
  0x30   : > { %s156_s17 = sand.u32 1, %s733_s14   ;;  %s449_s22 = sshll.u32 %s737_s15, 7 }
  0x31   : > { %s952_s10 = scalar_select %p849_p3, 1, 0 }
  0x32   : > { %s448_s21 = sshll.u32 %s156_s17, 3  ;;  %s862_s25 = scalar_lea.hbm %s939_s0, %s449_s22 }
  0x33   : > { %s160_s26 = scalar_lea.vmem [#allocation2], %s448_s21  ;;  %p864_p11 = pnand %p543_p7, %p36_p9 }
  0x34   : > { %s167_s27 = sshll.u32 %s160_s26, 4  ;;  %s157_s29 = scalar_lea.sflag [#allocation3], %s156_s17  ;;  %s168_s27 = int_to_ptr.vmem [resolvable:$true] %s167_s27 }
  0x35   : > { %s641_s30 = scalar_lea.hbm %s862_s25, 128  ;;  %p643_p0 = pneg %p864_p11 }
  0x36   : > { %p642_p13 = scmp.ne.s32.totalorder %s862_s25, %s641_s30  ;;  %s646_s6 = scalar_lea.hbm %s939_s0, 256 }
  0x37   : > { %p647_p1 = scmp.lt.s32.totalorder %s862_s25, %s939_s0  ;;  %p648_p2 = scmp.lt.s32.totalorder %s646_s6, %s641_s30 }
  0x38   : > { %p644_p5 = pnand %p643_p0, %p642_p13 }
  0x39   : > { %p649_p6 = por %p648_p2, %p647_p1 }
  0x3a   : > { %p645_p10 = pneg %p644_p5 }
  0x3c   : > { %p650_p12 = pnand %p649_p6, %p645_p10 }
  0x3e   : > { %653 = shalt.err (!%p650_p12)
}
  0x3f   : > { %s654_s21 = scalar_lea.vmem %s168_s27, 128  ;;  %s743_s17 = smov [#allocation2]  }
  0x40   : > { %p655_p7 = scmp.ne.s32.totalorder %s168_s27, %s654_s21  ;;  %s659_s22 = sshll.u32 %s743_s17, 4  ;;  %s660_s22 = int_to_ptr.vmem [resolvable:$false] %s659_s22 }
  0x41   : > { %s661_s23 = scalar_lea.vmem %s660_s22, 256  ;;  %p662_p13 = scmp.lt.s32.totalorder %s168_s27, %s660_s22 }
  0x42   : > { %p657_p9 = pnand %p655_p7, %p643_p0  ;;  %p663_p5 = scmp.lt.s32.totalorder %s661_s23, %s654_s21 }
  0x44   : > { %p658_p3 = pneg %p657_p9  ;;  %p664_p4 = por %p663_p5, %p662_p13 }
  0x46   : > { %p665_p8 = pnand %p664_p4, %p658_p3 }
  0x48   : > { %668 = shalt.err (!%p665_p8)
}
  0x49   : > { %536 = dma.hbm_to_vmem [thread:$0]  (!%p864_p11), %s862_s25, 128, %s168_s27, %s157_s29  }
  0x4a   : > { %p954_p10 = scmp.ne.s32.totalorder %s949_s20, 0 }
  0x4b   : > { %s885_s24 = sand.u32 (!%p954_p10), 1, %s729_s13   ;;  %p955_p4 = scmp.ne.s32.totalorder (!%p954_p10), %s947_s18, 0 }
  0x4c   : > { %176 = sbr.rel (%p954_p10) target bundleno = 654 (0x28e), region = 32  ;;  %s451_s26 = sshll.u32 (!%p954_p10), %s885_s24, 3 }
  0x4d   : > { %s179_s30 = scalar_lea.sflag (!%p954_p10), [#allocation3], %s885_s24  ;;  %s891_s4 = scalar_lea.vmem (!%p954_p10), [#allocation2], %s451_s26 }
  0x51   : > { %712 = dma.done.wait (%p955_p4), %s179_s30, 128  }
  0x52   : > { %714 = vsyncadd (%p955_p4), %s179_s30, 4294967168  ;;  %p956_p8 = scmp.eq.s32.totalorder %s788_s16, 0 }
  0x54   : > { %716 = dma.done.wait (%p956_p8), [#allocation6], 2112   ;;  %p957_p3 = pmov %p956_p8 }
  0x55   : > { %v744_v0 = vmov 0.0   ;;  %vm745_vm0 = vmmov 0   ;;  %v229_v1 = vld [vmem:[#allocation5 + $0x78] sm:$0xff]  ;;  %v228_v2 = vld [vmem:[#allocation5 + $0x70] sm:$0xff]  ;;  %v227_v3 = vld [vmem:[#allocation5 + $0x68] sm:$0xff]  ;;  %s459_s18 = sshll.u32 %s788_s16, 7 }
  0x56   : > { %718 = vsyncadd (%p957_p3), [#allocation6], 4294965184  ;;  %479 = vmatprep.subr.mxu0 %v744_v0  ;;  %511 = vmatprep.mubr.msk.f32.mxu0 %vm745_vm0, %v744_v0  ;;  %v226_v4 = vld [vmem:[#allocation5 + $0x60] sm:$0xff]  ;;  %v225_v5 = vld [vmem:[#allocation5 + $0x58] sm:$0xff]  ;;  %s212_s20 = scalar_lea.vmem [#allocation8], %s451_s26  ;;  %s352_s29 = scalar_lea.hbm %s942_s3, %s459_s18 }
  0x57   : > { %480 = vmatpush3.msra.mxu0 %v229_v1  ;;  %v224_v6 = vld [vmem:[#allocation5 + $0x50] sm:$0xff]  ;;  %v223_v7 = vld [vmem:[#allocation5 + $0x48] sm:$0xff]  ;;  %v222_v8 = vld [vmem:[#allocation5 + $0x40] sm:$0xff]  ;;  %s354_s25 = sshll.u32 %s212_s20, 4  ;;  %s341_s5 = scalar_lea.sflag [#allocation4], %s885_s24  ;;  %s355_s25 = int_to_ptr.vmem [resolvable:$true] %s354_s25 }
  0x58   : > { %481 = vmatprep.subr.mxu0 %v744_v0  ;;  %v221_v9 = vld [vmem:[#allocation5 + $0x38] sm:$0xff]  ;;  %v220_v10 = vld [vmem:[#allocation5 + $0x30] sm:$0xff]  ;;  %v219_v11 = vld [vmem:[#allocation5 + $0x28] sm:$0xff]  ;;  %s669_s6 = scalar_lea.vmem %s355_s25, 128  ;;  %p958_p0 = scmp.ne.s32.totalorder %s952_s10, 0 }
  0x59   : > { %482 = vmatpush3.msra.mxu0 %v228_v2  ;;  %v218_v12 = vld [vmem:[#allocation5 + $0x20] sm:$0xff]  ;;  %v217_v13 = vld [vmem:[#allocation5 + $0x18] sm:$0xff]  ;;  %v216_v14 = vld [vmem:[#allocation5 + $0x10] sm:$0xff]  ;;  %p670_p11 = scmp.ne.s32.totalorder %s355_s25, %s669_s6  ;;  %s746_s8 = smov [#allocation8]  }
  0x5a   : > { %483 = vmatprep.subr.mxu0 %v744_v0  ;;  %v215_v15 = vld [vmem:[#allocation5 + $0x8] sm:$0xff]  ;;  %v214_v16 = vld [vmem:[#allocation5] sm:$0xff]  ;;  %v213_v17 = vld [vmem:[%s891_s4] sm:$0xff]  ;;  %s673_s9 = sshll.u32 %s746_s8, 4  ;;  %s674_s9 = int_to_ptr.vmem [resolvable:$false] %s673_s9 }
  0x5b   : > { %484 = vmatpush3.msra.mxu0 %v227_v3  ;;  %v455_v18 = vld [vmem:[#allocation7] ss:$0 sm:$0xff]  ;;  %v456_v37 = vld [vmem:[#allocation7 + $0x1] ss:$0 sm:$0xff]  ;;  %v457_v41 = vld [vmem:[#allocation7 + $0x2] ss:$0 sm:$0xff]  ;;  %p671_p1 = pnand %p670_p11, %p958_p0  ;;  %p676_p6 = scmp.lt.s32.totalorder %s355_s25, %s674_s9 }
  0x5c   : > { %485 = vmatprep.subr.mxu0 %v744_v0  ;;  %s675_s16 = scalar_lea.vmem %s674_s9, 256 }
  0x5d   : > { %486 = vmatpush3.msra.mxu0 %v226_v4  ;;  %p672_p2 = pneg %p671_p1  ;;  %p677_p12 = scmp.lt.s32.totalorder %s675_s16, %s669_s6 }
  0x5e   : > { %487 = vmatprep.subr.mxu0 %v744_v0 }
  0x5f   : > { %488 = vmatpush3.msra.mxu0 %v225_v5  ;;  %p678_p7 = por %p677_p12, %p676_p6 }
  0x60   : > { %489 = vmatprep.subr.mxu0 %v744_v0 }
  0x61   : > { %490 = vmatpush3.msra.mxu0 %v224_v6  ;;  %p679_p9 = pnand %p678_p7, %p672_p2 }
  0x62   : > { %491 = vmatprep.subr.mxu0 %v744_v0 }
  0x63   : > { %492 = vmatpush3.msra.mxu0 %v223_v7 }
  0x64   : > { %493 = vmatprep.subr.mxu0 %v744_v0 }
  0x65   : > { %494 = vmatpush3.msra.mxu0 %v222_v8 }
  0x66   : > { %495 = vmatprep.subr.mxu0 %v744_v0 }
  0x67   : > { %496 = vmatpush3.msra.mxu0 %v221_v9 }
  0x68   : > { %497 = vmatprep.subr.mxu0 %v744_v0 }
  0x69   : > { %498 = vmatpush3.msra.mxu0 %v220_v10 }
  0x6a   : > { %499 = vmatprep.subr.mxu0 %v744_v0 }
  0x6b   : > { %500 = vmatpush3.msra.mxu0 %v219_v11 }
  0x6c   : > { %501 = vmatprep.subr.mxu0 %v744_v0 }
  0x6d   : > { %502 = vmatpush3.msra.mxu0 %v218_v12 }
  0x6e   : > { %503 = vmatprep.subr.mxu0 %v744_v0 }
  0x6f   : > { %504 = vmatpush3.msra.mxu0 %v217_v13 }
  0x70   : > { %505 = vmatprep.subr.mxu0 %v744_v0 }
  0x71   : > { %506 = vmatpush3.msra.mxu0 %v216_v14 }
  0x72   : > { %507 = vmatprep.subr.mxu0 %v744_v0 }
  0x73   : > { %508 = vmatpush3.msra.mxu0 %v215_v15 }
  0x74   : > { %509 = vmatprep.subr.mxu0 %v744_v0 }
  0x75   : > { %510 = vmatpush3.msra.mxu0 %v214_v16 }
  0x76   : > { %512 = vmatmul.mubr.f32.vlgmr.msra.gmra.mxu0 %v213_v17 }
 0x136   : > { %v303_v19 = vpop.f32.mrf.mxu0 }
 0x137   : > { %v304_v20 = vadd.f32 %v455_v18, %v303_v19 }
 0x138   : > { %v513_v21 = vpop.f32.mrf.mxu0 }
 0x139   : > { %307 = vadd.xlane.f32.xlu0 %v304_v20 }
 0x1c2   : > { %v308_v22 = vpop.xlane.xlu0 %307 }
 0x1c3   : > { %v309_v23 = vmul.f32 0.03125, %v308_v22 }
 0x1c5   : > { %v310_v24 = vsub.f32 %v304_v20, %v309_v23  ;;  %v314_v26 = vmul.f32 %v309_v23, %v309_v23 }
 0x1c7   : > { %v311_v25 = vmul.f32 %v310_v24, %v310_v24  ;;  %v315_v27 = vmul.f32 96.0, %v314_v26 }
 0x1c9   : > { %312 = vadd.xlane.f32.xlu0 %v311_v25 }
 0x252   : > { %v313_v28 = vpop.xlane.xlu0 %312 }
 0x253   : > { %v316_v29 = vsub.f32 %v313_v28, %v315_v27 }
 0x255   : > { %v317_v30 = vmul.f32 0.032258064, %v316_v29 }
 0x257   : > { %585 = vrsqrt.f32 %v317_v30  ;;  %vm320_vm1 = vcmp.eq.f32.partialorder %v317_v30, inf  ;;  %v323_v33 = vand.u32 2147483648, %v317_v30  ;;  %vm322_vm2 = vcmp.eq.f32.partialorder %v317_v30, 0.0 }
 0x264   : > { %v586_v31 = vpop.eup %585 }
 0x265   : > { %v319_v32 = vmul.f32 %v586_v31, %v317_v30 }
 0x267   : > { %v321_v34 = vsel %vm320_vm1, %v317_v30, %v319_v32 }
 0x268   : > { %v324_v35 = vsel %vm322_vm2, %v323_v33, %v321_v34 }
 0x269   : > { %v325_v36 = vadd.f32 1e-06, %v324_v35 }
 0x26b   : > { %587 = vrcp.f32 %v325_v36 }
 0x278   : > { %v588_v38 = vpop.eup %587 }
 0x279   : > { %v331_v39 = vmul.f32 %v588_v38, %v456_v37 }
 0x27b   : > { %v332_v40 = vmul.f32 %v331_v39, %v310_v24 }
 0x27d   : > { %v333_v42 = vadd.f32 %v332_v40, %v213_v17 }
 0x27f   : > { %v338_v43 = vadd.f32 %v457_v41, %v333_v42 }
 0x281   : > { %339 = vst [vmem:[%s212_s20] sm:$0xff] %v338_v43 }
 0x282   : > { %682 = shalt.err (!%p679_p9)
}
 0x283   : > { %s683_s21 = scalar_lea.hbm %s352_s29, 128  ;;  %s687_s23 = scalar_lea.hbm %s942_s3, 256 }
 0x284   : > { %p684_p13 = scmp.ne.s32.totalorder %s352_s29, %s683_s21  ;;  %p688_p4 = scmp.lt.s32.totalorder %s352_s29, %s942_s3 }
 0x285   : > { %p689_p8 = scmp.lt.s32.totalorder %s687_s23, %s683_s21 }
 0x286   : > { %p685_p5 = pnand %p684_p13, %p958_p0 }
 0x287   : > { %p690_p3 = por %p689_p8, %p688_p4 }
 0x288   : > { %p686_p10 = pneg %p685_p5 }
 0x28a   : > { %p691_p11 = pnand %p690_p3, %p686_p10 }
 0x28c   : > { %694 = shalt.err (!%p691_p11)
}
 0x28d   : > { %524 = dma.vmem_to_hbm [thread:$0]  (%p958_p0), %s355_s25, 128, %s352_s29, %s341_s5  }
 0x28e PF: > { %s366_s30 = sand.u32 1, %s725_s12   ;;  %p959_p1 = scmp.ne.s32.totalorder %s948_s19, 0 }
 0x28f   : > { %p960_p2 = scmp.ge.s32.totalorder %s737_s15, 2  ;;  %s367_s4 = scalar_lea.sflag [#allocation4], %s366_s30 }
 0x291   : > { %p538_p6 = pnand %p960_p2, %p959_p1 }
 0x293   : > { %p539_p12 = pneg %p538_p6 }
 0x295   : > { %720 = dma.done.wait (%p539_p12), %s367_s4, 128  }
 0x296   : > { %722 = vsyncadd (%p539_p12), %s367_s4, 4294967168  ;;  %p17_p7 = scmp.ge.s32.totalorder %s839_s7, 4   ;;  %s961_s12 = smov %s729_s13 }
 0x297   : > { %s962_s13 = smov %s733_s14  ;;  %s963_s14 = smov %s855_s11 }
 0x298   : > { %s964_s15 = smov %s839_s7  ;;  %19 = sbr.rel (!%p17_p7) target bundleno = 6 (0x6), region = 85 }
 0x29d   :  { %372 = vsyncpa [#allocation3], 1 }
 0x29e   :  { %374 = vsyncpa [#allocation3 + $0x1], 1 }
 0x29f   :  { %375 = vsyncpa [#allocation6], 1 }
 0x2a0   :  { %376 = vsyncpa [#allocation4], 1 }
 0x2a1   :  { %378 = vsyncpa [#allocation4 + $0x1], 1 }

// kernel: tpu_custom_call.1
= control target key start
LH: loop header
LB: loop body
LE: loop exit
PB: predicated region body
PF: predicated region fallthrough
CT: control target
= control target key end

     0   :  { %8 = vsyncpa [#allocation3], 0  ;;  %s939_s0 = inlined_call_operand.hbm [shape: f32[16,128], index: 0, kind: input, shape index: {}]   ;;  %s940_s1 = inlined_call_operand.hbm [shape: f32[128,128], index: 1, kind: input, shape index: {}]   ;;  %s941_s2 = inlined_call_operand.hbm [shape: f32[3,128], index: 2, kind: input, shape index: {}]   ;;  %s942_s3 = inlined_call_operand.hbm [shape: f32[16,128], index: 3, kind: output, shape index: {}]  }
   0x1   :  { %10 = vsyncpa [#allocation3 + $0x1], 0 }
   0x2   :  { %11 = vsyncpa [#allocation6], 0 }
   0x3   :  { %12 = vsyncpa [#allocation4], 0 }
   0x4   :  { %14 = vsyncpa [#allocation4 + $0x1], 0  ;;  %s767_s12 = smov 0   ;;  %s769_s13 = smov 0  }
   0x5   :  { %s771_s14 = smov 0   ;;  %s773_s15 = smov 0  }
   0x6 LB: > { %s788_s16 = sadd.s32 4294967295, %s737_s15   ;;  %s443_s17 = sadd.s32 4294967294, %s737_s15   ;;  %s737_s15 = sphi %s773_s15, %s964_s15   ;;  %s733_s14 = sphi %s771_s14, %s963_s14   ;;  %s729_s13 = sphi %s769_s13, %s962_s13   ;;  %s725_s12 = sphi %s767_s12, %s961_s12  }
   0x7   : > { %p40_p0 = scmp.ne.s32.totalorder %s729_s13, %s725_s12  ;;  %p943_p1 = scmp.eq.s32.totalorder %s788_s16, 0 }
   0x8   : > { %p112_p3 = scmp.eq.s32.totalorder %s443_s17, 1  ;;  %p444_p5 = scmp.ge.s32.totalorder %s737_s15, 1 }
   0x9   : > { %p797_p4 = por %p943_p1, %p40_p0  ;;  %p119_p7 = scmp.lt.s32.totalorder %s737_s15, 3 }
   0xa   : > { %p802_p6 = por %p112_p3, %p40_p0  ;;  %s739_s21 = smov [#allocation5]  }
   0xb   : > { %s947_s18 = scalar_select %p797_p4, 1, 0 }
   0xc   : > { %s948_s19 = scalar_select %p802_p6, 1, 0 }
   0xd   : > { %p807_p8 = pnand %p444_p5, %p119_p7  ;;  %s131_s22 = sshll.u32 %s739_s21, 4  ;;  %s132_s22 = int_to_ptr.vmem [resolvable:$true] %s131_s22 }
   0xe   : > { %s740_s24 = smov [#allocation7]   ;;  %s600_s26 = scalar_lea.vmem %s132_s22, 2048 }
   0xf   : > { %s949_s20 = scalar_select %p807_p8, 1, 0 }
  0x10   : > { %p526_p9 = pneg %p807_p8  ;;  %s145_s25 = sshll.u32 %s740_s24, 4  ;;  %s146_s25 = int_to_ptr.vmem [resolvable:$true] %s145_s25 }
  0x11   : > { %p601_p13 = scmp.ne.s32.totalorder %s132_s22, %s600_s26  ;;  %p608_p5 = scmp.lt.s32.totalorder %s132_s22, %s132_s22 }
  0x12   : > { %p816_p11 = pnand %p526_p9, %p943_p1  ;;  %p609_p7 = scmp.lt.s32.totalorder %s600_s26, %s600_s26 }
  0x14   : > { %p591_p12 = pneg %p816_p11  ;;  %p610_p10 = por %p609_p7, %p608_p5 }
  0x16   : > { %p603_p0 = pnand %p601_p13, %p591_p12 }
  0x18   : > { %p604_p3 = pneg %p603_p0 }
  0x1a   : > { %p611_p9 = pnand %p610_p10, %p604_p3 }
  0x1c   : > { %614 = shalt.err (!%p611_p9)
}
  0x1d   : > { %s741_s27 = smov 128   ;;  %s742_s28 = smov 8  }
  0x1e   : > { %529 = dma.hbm_to_vmem [thread:$0]  (!%p816_p11), %s940_s1, 2048, %s132_s22, [#allocation6], %s741_s27, %s741_s27, %s742_s28  }
  0x1f   : > { %s626_s4 = scalar_lea.vmem %s146_s25, 64  ;;  %p634_p2 = scmp.lt.s32.totalorder %s146_s25, %s146_s25 }
  0x20   : > { %p627_p1 = scmp.ne.s32.totalorder %s146_s25, %s626_s4  ;;  %p635_p6 = scmp.lt.s32.totalorder %s626_s4, %s626_s4 }
  0x22   : > { %p629_p13 = pnand %p627_p1, %p591_p12  ;;  %p636_p5 = por %p635_p6, %p634_p2 }
  0x24   : > { %p630_p0 = pneg %p629_p13 }
  0x26   : > { %p637_p10 = pnand %p636_p5, %p630_p0 }
  0x28   : > { %640 = shalt.err (!%p637_p10)
}
  0x29   : > { %532 = dma.hbm_to_vmem [thread:$0]  (!%p816_p11), %s941_s2, 64, %s146_s25, [#allocation6]  }
  0x2a   : > { %s839_s7 = sadd.s32 1, %s737_s15   ;;  %s27_s8 = sadd.s32 1, %s733_s14 }
  0x2b   : > { %s24_s9 = ssub.s32 %s737_s15, %s839_s7  ;;  %p34_p1 = scmp.ne.s32.totalorder %s733_s14, %s729_s13 }
  0x2c   : > { %p25_p2 = scmp.eq.s32.totalorder %s24_s9, 0  ;;  %p35_p6 = scmp.eq.s32.totalorder %s737_s15, 0 }
  0x2d   : > { %p951_p12 = scmp.eq.s32.totalorder %s788_s16, 1  ;;  %p543_p7 = scmp.lt.s32.totalorder %s737_s15, 2 }
  0x2e   : > { %s855_s11 = scalar_select %p25_p2, %s733_s14, %s27_s8  }
  0x2f   : > { %p849_p3 = por %p951_p12, %p34_p1  ;;  %p36_p9 = por %p35_p6, %p34_p1 }
  0x30   : > { %s156_s17 = sand.u32 1, %s733_s14   ;;  %s449_s22 = sshll.u32 %s737_s15, 7 }
  0x31   : > { %s952_s10 = scalar_select %p849_p3, 1, 0 }
  0x32   : > { %s448_s21 = sshll.u32 %s156_s17, 3  ;;  %s862_s25 = scalar_lea.hbm %s939_s0, %s449_s22 }
  0x33   : > { %s160_s26 = scalar_lea.vmem [#allocation2], %s448_s21  ;;  %p864_p11 = pnand %p543_p7, %p36_p9 }
  0x34   : > { %s167_s27 = sshll.u32 %s160_s26, 4  ;;  %s157_s29 = scalar_lea.sflag [#allocation3], %s156_s17  ;;  %s168_s27 = int_to_ptr.vmem [resolvable:$true] %s167_s27 }
  0x35   : > { %s641_s30 = scalar_lea.hbm %s862_s25, 128  ;;  %p643_p0 = pneg %p864_p11 }
  0x36   : > { %p642_p13 = scmp.ne.s32.totalorder %s862_s25, %s641_s30  ;;  %s646_s6 = scalar_lea.hbm %s939_s0, 256 }
  0x37   : > { %p647_p1 = scmp.lt.s32.totalorder %s862_s25, %s939_s0  ;;  %p648_p2 = scmp.lt.s32.totalorder %s646_s6, %s641_s30 }
  0x38   : > { %p644_p5 = pnand %p643_p0, %p642_p13 }
  0x39   : > { %p649_p6 = por %p648_p2, %p647_p1 }
  0x3a   : > { %p645_p10 = pneg %p644_p5 }
  0x3c   : > { %p650_p12 = pnand %p649_p6, %p645_p10 }
  0x3e   : > { %653 = shalt.err (!%p650_p12)
}
  0x3f   : > { %s654_s21 = scalar_lea.vmem %s168_s27, 128  ;;  %s743_s17 = smov [#allocation2]  }
  0x40   : > { %p655_p7 = scmp.ne.s32.totalorder %s168_s27, %s654_s21  ;;  %s659_s22 = sshll.u32 %s743_s17, 4  ;;  %s660_s22 = int_to_ptr.vmem [resolvable:$false] %s659_s22 }
  0x41   : > { %s661_s23 = scalar_lea.vmem %s660_s22, 256  ;;  %p662_p13 = scmp.lt.s32.totalorder %s168_s27, %s660_s22 }
  0x42   : > { %p657_p9 = pnand %p655_p7, %p643_p0  ;;  %p663_p5 = scmp.lt.s32.totalorder %s661_s23, %s654_s21 }
  0x44   : > { %p658_p3 = pneg %p657_p9  ;;  %p664_p4 = por %p663_p5, %p662_p13 }
  0x46   : > { %p665_p8 = pnand %p664_p4, %p658_p3 }
  0x48   : > { %668 = shalt.err (!%p665_p8)
}
  0x49   : > { %536 = dma.hbm_to_vmem [thread:$0]  (!%p864_p11), %s862_s25, 128, %s168_s27, %s157_s29  }
  0x4a   : > { %p954_p10 = scmp.ne.s32.totalorder %s949_s20, 0 }
  0x4b   : > { %s885_s24 = sand.u32 (!%p954_p10), 1, %s729_s13   ;;  %p955_p4 = scmp.ne.s32.totalorder (!%p954_p10), %s947_s18, 0 }
  0x4c   : > { %176 = sbr.rel (%p954_p10) target bundleno = 654 (0x28e), region = 32  ;;  %s451_s26 = sshll.u32 (!%p954_p10), %s885_s24, 3 }
  0x4d   : > { %s179_s30 = scalar_lea.sflag (!%p954_p10), [#allocation3], %s885_s24  ;;  %s891_s4 = scalar_lea.vmem (!%p954_p10), [#allocation2], %s451_s26 }
  0x51   : > { %712 = dma.done.wait (%p955_p4), %s179_s30, 128  }
  0x52   : > { %714 = vsyncadd (%p955_p4), %s179_s30, 4294967168  ;;  %p956_p8 = scmp.eq.s32.totalorder %s788_s16, 0 }
  0x54   : > { %716 = dma.done.wait (%p956_p8), [#allocation6], 2112   ;;  %p957_p3 = pmov %p956_p8 }
  0x55   : > { %v744_v0 = vmov 0.0   ;;  %vm745_vm0 = vmmov 0   ;;  %v229_v1 = vld [vmem:[#allocation5 + $0x78] sm:$0xff]  ;;  %v228_v2 = vld [vmem:[#allocation5 + $0x70] sm:$0xff]  ;;  %v227_v3 = vld [vmem:[#allocation5 + $0x68] sm:$0xff]  ;;  %s459_s18 = sshll.u32 %s788_s16, 7 }
  0x56   : > { %718 = vsyncadd (%p957_p3), [#allocation6], 4294965184  ;;  %479 = vmatprep.subr.mxu0 %v744_v0  ;;  %511 = vmatprep.mubr.msk.f32.mxu0 %vm745_vm0, %v744_v0  ;;  %v226_v4 = vld [vmem:[#allocation5 + $0x60] sm:$0xff]  ;;  %v225_v5 = vld [vmem:[#allocation5 + $0x58] sm:$0xff]  ;;  %s212_s20 = scalar_lea.vmem [#allocation8], %s451_s26  ;;  %s352_s29 = scalar_lea.hbm %s942_s3, %s459_s18 }
  0x57   : > { %480 = vmatpush3.msra.mxu0 %v229_v1  ;;  %v224_v6 = vld [vmem:[#allocation5 + $0x50] sm:$0xff]  ;;  %v223_v7 = vld [vmem:[#allocation5 + $0x48] sm:$0xff]  ;;  %v222_v8 = vld [vmem:[#allocation5 + $0x40] sm:$0xff]  ;;  %s354_s25 = sshll.u32 %s212_s20, 4  ;;  %s341_s5 = scalar_lea.sflag [#allocation4], %s885_s24  ;;  %s355_s25 = int_to_ptr.vmem [resolvable:$true] %s354_s25 }
  0x58   : > { %481 = vmatprep.subr.mxu0 %v744_v0  ;;  %v221_v9 = vld [vmem:[#allocation5 + $0x38] sm:$0xff]  ;;  %v220_v10 = vld [vmem:[#allocation5 + $0x30] sm:$0xff]  ;;  %v219_v11 = vld [vmem:[#allocation5 + $0x28] sm:$0xff]  ;;  %s669_s6 = scalar_lea.vmem %s355_s25, 128  ;;  %p958_p0 = scmp.ne.s32.totalorder %s952_s10, 0 }
  0x59   : > { %482 = vmatpush3.msra.mxu0 %v228_v2  ;;  %v218_v12 = vld [vmem:[#allocation5 + $0x20] sm:$0xff]  ;;  %v217_v13 = vld [vmem:[#allocation5 + $0x18] sm:$0xff]  ;;  %v216_v14 = vld [vmem:[#allocation5 + $0x10] sm:$0xff]  ;;  %p670_p11 = scmp.ne.s32.totalorder %s355_s25, %s669_s6  ;;  %s746_s8 = smov [#allocation8]  }
  0x5a   : > { %483 = vmatprep.subr.mxu0 %v744_v0  ;;  %v215_v15 = vld [vmem:[#allocation5 + $0x8] sm:$0xff]  ;;  %v214_v16 = vld [vmem:[#allocation5] sm:$0xff]  ;;  %v213_v17 = vld [vmem:[%s891_s4] sm:$0xff]  ;;  %s673_s9 = sshll.u32 %s746_s8, 4  ;;  %s674_s9 = int_to_ptr.vmem [resolvable:$false] %s673_s9 }
  0x5b   : > { %484 = vmatpush3.msra.mxu0 %v227_v3  ;;  %v455_v18 = vld [vmem:[#allocation7] ss:$0 sm:$0xff]  ;;  %v456_v37 = vld [vmem:[#allocation7 + $0x1] ss:$0 sm:$0xff]  ;;  %v457_v41 = vld [vmem:[#allocation7 + $0x2] ss:$0 sm:$0xff]  ;;  %p671_p1 = pnand %p670_p11, %p958_p0  ;;  %p676_p6 = scmp.lt.s32.totalorder %s355_s25, %s674_s9 }
  0x5c   : > { %485 = vmatprep.subr.mxu0 %v744_v0  ;;  %s675_s16 = scalar_lea.vmem %s674_s9, 256 }
  0x5d   : > { %486 = vmatpush3.msra.mxu0 %v226_v4  ;;  %p672_p2 = pneg %p671_p1  ;;  %p677_p12 = scmp.lt.s32.totalorder %s675_s16, %s669_s6 }
  0x5e   : > { %487 = vmatprep.subr.mxu0 %v744_v0 }
  0x5f   : > { %488 = vmatpush3.msra.mxu0 %v225_v5  ;;  %p678_p7 = por %p677_p12, %p676_p6 }
  0x60   : > { %489 = vmatprep.subr.mxu0 %v744_v0 }
  0x61   : > { %490 = vmatpush3.msra.mxu0 %v224_v6  ;;  %p679_p9 = pnand %p678_p7, %p672_p2 }
  0x62   : > { %491 = vmatprep.subr.mxu0 %v744_v0 }
  0x63   : > { %492 = vmatpush3.msra.mxu0 %v223_v7 }
  0x64   : > { %493 = vmatprep.subr.mxu0 %v744_v0 }
  0x65   : > { %494 = vmatpush3.msra.mxu0 %v222_v8 }
  0x66   : > { %495 = vmatprep.subr.mxu0 %v744_v0 }
  0x67   : > { %496 = vmatpush3.msra.mxu0 %v221_v9 }
  0x68   : > { %497 = vmatprep.subr.mxu0 %v744_v0 }
  0x69   : > { %498 = vmatpush3.msra.mxu0 %v220_v10 }
  0x6a   : > { %499 = vmatprep.subr.mxu0 %v744_v0 }
  0x6b   : > { %500 = vmatpush3.msra.mxu0 %v219_v11 }
  0x6c   : > { %501 = vmatprep.subr.mxu0 %v744_v0 }
  0x6d   : > { %502 = vmatpush3.msra.mxu0 %v218_v12 }
  0x6e   : > { %503 = vmatprep.subr.mxu0 %v744_v0 }
  0x6f   : > { %504 = vmatpush3.msra.mxu0 %v217_v13 }
  0x70   : > { %505 = vmatprep.subr.mxu0 %v744_v0 }
  0x71   : > { %506 = vmatpush3.msra.mxu0 %v216_v14 }
  0x72   : > { %507 = vmatprep.subr.mxu0 %v744_v0 }
  0x73   : > { %508 = vmatpush3.msra.mxu0 %v215_v15 }
  0x74   : > { %509 = vmatprep.subr.mxu0 %v744_v0 }
  0x75   : > { %510 = vmatpush3.msra.mxu0 %v214_v16 }
  0x76   : > { %512 = vmatmul.mubr.f32.vlgmr.msra.gmra.mxu0 %v213_v17 }
 0x136   : > { %v303_v19 = vpop.f32.mrf.mxu0 }
 0x137   : > { %v304_v20 = vadd.f32 %v455_v18, %v303_v19 }
 0x138   : > { %v513_v21 = vpop.f32.mrf.mxu0 }
 0x139   : > { %307 = vadd.xlane.f32.xlu0 %v304_v20 }
 0x1c2   : > { %v308_v22 = vpop.xlane.xlu0 %307 }
 0x1c3   : > { %v309_v23 = vmul.f32 0.03125, %v308_v22 }
 0x1c5   : > { %v310_v24 = vsub.f32 %v304_v20, %v309_v23  ;;  %v314_v26 = vmul.f32 %v309_v23, %v309_v23 }
 0x1c7   : > { %v311_v25 = vmul.f32 %v310_v24, %v310_v24  ;;  %v315_v27 = vmul.f32 96.0, %v314_v26 }
 0x1c9   : > { %312 = vadd.xlane.f32.xlu0 %v311_v25 }
 0x252   : > { %v313_v28 = vpop.xlane.xlu0 %312 }
 0x253   : > { %v316_v29 = vsub.f32 %v313_v28, %v315_v27 }
 0x255   : > { %v317_v30 = vmul.f32 0.032258064, %v316_v29 }
 0x257   : > { %585 = vrsqrt.f32 %v317_v30  ;;  %vm320_vm1 = vcmp.eq.f32.partialorder %v317_v30, inf  ;;  %v323_v33 = vand.u32 2147483648, %v317_v30  ;;  %vm322_vm2 = vcmp.eq.f32.partialorder %v317_v30, 0.0 }
 0x264   : > { %v586_v31 = vpop.eup %585 }
 0x265   : > { %v319_v32 = vmul.f32 %v586_v31, %v317_v30 }
 0x267   : > { %v321_v34 = vsel %vm320_vm1, %v317_v30, %v319_v32 }
 0x268   : > { %v324_v35 = vsel %vm322_vm2, %v323_v33, %v321_v34 }
 0x269   : > { %v325_v36 = vadd.f32 1e-06, %v324_v35 }
 0x26b   : > { %587 = vrcp.f32 %v325_v36 }
 0x278   : > { %v588_v38 = vpop.eup %587 }
 0x279   : > { %v331_v39 = vmul.f32 %v588_v38, %v456_v37 }
 0x27b   : > { %v332_v40 = vmul.f32 %v331_v39, %v310_v24 }
 0x27d   : > { %v333_v42 = vadd.f32 %v332_v40, %v213_v17 }
 0x27f   : > { %v338_v43 = vadd.f32 %v457_v41, %v333_v42 }
 0x281   : > { %339 = vst [vmem:[%s212_s20] sm:$0xff] %v338_v43 }
 0x282   : > { %682 = shalt.err (!%p679_p9)
}
 0x283   : > { %s683_s21 = scalar_lea.hbm %s352_s29, 128  ;;  %s687_s23 = scalar_lea.hbm %s942_s3, 256 }
 0x284   : > { %p684_p13 = scmp.ne.s32.totalorder %s352_s29, %s683_s21  ;;  %p688_p4 = scmp.lt.s32.totalorder %s352_s29, %s942_s3 }
 0x285   : > { %p689_p8 = scmp.lt.s32.totalorder %s687_s23, %s683_s21 }
 0x286   : > { %p685_p5 = pnand %p684_p13, %p958_p0 }
 0x287   : > { %p690_p3 = por %p689_p8, %p688_p4 }
 0x288   : > { %p686_p10 = pneg %p685_p5 }
 0x28a   : > { %p691_p11 = pnand %p690_p3, %p686_p10 }
 0x28c   : > { %694 = shalt.err (!%p691_p11)
}
 0x28d   : > { %524 = dma.vmem_to_hbm [thread:$0]  (%p958_p0), %s355_s25, 128, %s352_s29, %s341_s5  }
 0x28e PF: > { %s366_s30 = sand.u32 1, %s725_s12   ;;  %p959_p1 = scmp.ne.s32.totalorder %s948_s19, 0 }
 0x28f   : > { %p960_p2 = scmp.ge.s32.totalorder %s737_s15, 2  ;;  %s367_s4 = scalar_lea.sflag [#allocation4], %s366_s30 }
 0x291   : > { %p538_p6 = pnand %p960_p2, %p959_p1 }
 0x293   : > { %p539_p12 = pneg %p538_p6 }
 0x295   : > { %720 = dma.done.wait (%p539_p12), %s367_s4, 128  }
 0x296   : > { %722 = vsyncadd (%p539_p12), %s367_s4, 4294967168  ;;  %p17_p7 = scmp.ge.s32.totalorder %s839_s7, 4   ;;  %s961_s12 = smov %s729_s13 }
 0x297   : > { %s962_s13 = smov %s733_s14  ;;  %s963_s14 = smov %s855_s11 }
 0x298   : > { %s964_s15 = smov %s839_s7  ;;  %19 = sbr.rel (!%p17_p7) target bundleno = 6 (0x6), region = 85 }
 0x29d   :  { %372 = vsyncpa [#allocation3], 1 }
 0x29e   :  { %374 = vsyncpa [#allocation3 + $0x1], 1 }
 0x29f   :  { %375 = vsyncpa [#allocation6], 1 }
 0x2a0   :  { %376 = vsyncpa [#allocation4], 1 }
 0x2a1   :  { %378 = vsyncpa [#allocation4 + $0x1], 1 }

</bundles_post_ra>
